<compile_context>
chip_gen: v7x
topology: tpu7x:2x2x1
jax: 0.10.0
libtpu: 0.0.40
codegen_flags: <defaults>
</compile_context>

<pallas_src>
import functools
import math

import jax
import jax.numpy as jnp
from jax.experimental import pallas as pl
from jax.experimental.pallas import tpu as pltpu


def _round_up(x, m):
    return ((x + m - 1) // m) * m


# -----------------------------------------------------------------------------
# Pallas kernel: fused feature layers + layer1 + layer2 for one batch tile
# -----------------------------------------------------------------------------
def hybrid_rec_kernel(emb_ref, uf_ref, if_ref,
                      we_ref, wuf_ref, wif_ref, bui_ref,
                      w1_ref, b1_ref, w2_ref, b2_ref,
                      out_ref):
    f32, bf16 = jnp.float32, jnp.bfloat16
    emb = emb_ref[...]                                        # [TB, 2E] bf16

    # Fused user+item feature layers.  W_e is block-diagonal over
    # [u_emb | i_emb] -> [user_hidden | item_hidden]; the feature weights are
    # zero-padded into the same 2E-wide output.  f32 accumulation on the MXU.
    h_ui = jnp.dot(jnp.maximum(emb, 0), we_ref[...],
                   preferred_element_type=f32)                # [TB, 2E] f32
    h_ui += jnp.dot(jnp.maximum(uf_ref[...], 0.0).astype(bf16), wuf_ref[...],
                    preferred_element_type=f32)
    h_ui += jnp.dot(jnp.maximum(if_ref[...], 0.0).astype(bf16), wif_ref[...],
                    preferred_element_type=f32)
    # + bias + residual ([u_emb | i_emb]).  The residual uses the bf16
    # embedding table (documented deviation from the f32 PyTorch residual).
    h_ui = h_ui + bui_ref[...] + emb.astype(f32)

    # layer1 over cat([user_hidden, item_hidden]) == h_ui.  Dropout(p=0) == id.
    h = jnp.dot(jnp.maximum(h_ui, 0.0).astype(bf16), w1_ref[...],
                preferred_element_type=f32) + b1_ref[...]     # [TB, H] f32
    h = jnp.maximum(h, 0.0)

    # layer2 (H -> 1) as a narrow column dot; the (TB,1) store is hidden under
    # the MXU streaming passes above and the HBM writeback is contiguous.
    out = jnp.dot(h.astype(bf16), w2_ref[...],
                  preferred_element_type=f32) + b2_ref[...]   # [TB, 1] f32
    out_ref[...] = out.astype(out_ref.dtype)


# -----------------------------------------------------------------------------
# Wrapper: single fused embedding gather (glue JAX) and one pallas_call
# -----------------------------------------------------------------------------
def hybrid_rec_forward(user_id, item_id, user_features, item_features, params,
                       *, block_batch=4096):
    """block_batch = batch rows per grid step.  4096 amortizes the ~0.35 us
    per-step overhead and fits comfortably in a 64 MiB (v7x) VMEM budget;
    v6e (128 MiB VMEM) can use 8192."""
    p = params
    emb_table = p["emb_table"]            # [(U+1)+(I+1), E] bf16, user rows first
    two_e = p["w_e"].shape[0]             # 2 * embedding_size

    B = user_id.shape[0]
    TB = _round_up(min(block_batch, _round_up(B, 128)), 128)
    Bp = _round_up(B, TB)
    grid = (Bp // TB,)

    # One fused gather for both embeddings -> [Bp, 2E] with no concat copy.
    # Indices are padded before the gather so the slab is produced directly at
    # its padded shape.  TODO(synk): move this gather into the kernel
    # (scalar-prefetched ids + DMA gather from an HBM-resident table) to also
    # remove the [Bp, 2E] HBM round trip.
    ids = jnp.stack([user_id, item_id + p["item_offset"]], axis=-1)   # [B, 2]
    uf = user_features.astype(jnp.float32)
    if_ = item_features.astype(jnp.float32)
    if Bp != B:
        # Padded rows compute garbage (relu(0)@W + biases, ...) and are sliced
        # off below; never consume rows B..Bp of the padded output directly.
        pad = ((0, Bp - B), (0, 0))
        ids = jnp.pad(ids, pad)
        uf = jnp.pad(uf, pad)
        if_ = jnp.pad(if_, pad)
    emb = jnp.take(emb_table, ids, axis=0).reshape(Bp, two_e)   # [Bp, 2E] bf16

    UF, IF = uf.shape[1], if_.shape[1]
    H = p["w1_packed"].shape[1]
    resident = lambda i: (0, 0)           # weights/biases: same block every step

    cost = pl.CostEstimate(
        flops=int(2 * Bp * ((two_e + UF + IF) * two_e + two_e * H + H)),
        transcendentals=0,
        bytes_accessed=int(
            emb.size * 2 + uf.size * 4 + if_.size * 4 + Bp * 4
            + sum(a.size * a.dtype.itemsize for a in
                  (p["w_e"], p["w_uf"], p["w_if"], p["b_ui"],
                   p["w1_packed"], p["b1"], p["w2_col"], p["b2"]))))

    y = pl.pallas_call(
        hybrid_rec_kernel,
        out_shape=jax.ShapeDtypeStruct((Bp, 1), jnp.float32),
        grid=grid,
        in_specs=[
            pl.BlockSpec((TB, two_e), lambda i: (i, 0)),    # [u_emb|i_emb] bf16
            pl.BlockSpec((TB, UF), lambda i: (i, 0)),       # user features f32
            pl.BlockSpec((TB, IF), lambda i: (i, 0)),       # item features f32
            pl.BlockSpec(p["w_e"].shape, resident),
            pl.BlockSpec(p["w_uf"].shape, resident),
            pl.BlockSpec(p["w_if"].shape, resident),
            pl.BlockSpec(p["b_ui"].shape, resident),
            pl.BlockSpec(p["w1_packed"].shape, resident),
            pl.BlockSpec(p["b1"].shape, resident),
            pl.BlockSpec(p["w2_col"].shape, resident),
            pl.BlockSpec(p["b2"].shape, resident),
        ],
        out_specs=pl.BlockSpec((TB, 1), lambda i: (i, 0)),
        compiler_params=pltpu.CompilerParams(
            # "parallel": batch grid can be sharded across cores where
            # supported.  TODO(synk): on v7x verify the 2-TC split; if it does
            # not engage, switch this axis to pltpu.CORE_PARALLEL and add
            # pipeline_mode=pl.Buffered(3) on the streamed specs if xprof
            # shows exposed DMA.
            dimension_semantics=("parallel",),
            vmem_limit_bytes=int(min(100 * 2**20,
                                     max(32 * 2**20, TB * 10 * 1024)))),
        cost_estimate=cost,
    )(emb, uf, if_, p["w_e"], p["w_uf"], p["w_if"], p["b_ui"],
      p["w1_packed"], p["b1"], p["w2_col"], p["b2"])

    return y[:B]


# -----------------------------------------------------------------------------
# Deterministic parameter init (matches nn.Embedding / nn.Linear shapes)
# -----------------------------------------------------------------------------
def init_params(key, number_of_user, number_of_item,
                user_feature_size, item_feature_size,
                embedding_size, n_hidden):
    E, UF, IF, H = embedding_size, user_feature_size, item_feature_size, n_hidden
    bf16 = jnp.bfloat16
    ks = jax.random.split(key, 6)

    def linear(k, fan_in, fan_out):
        # torch.nn.Linear default init: U(-1/sqrt(fan_in), 1/sqrt(fan_in))
        kw, kb = jax.random.split(k)
        bound = 1.0 / math.sqrt(fan_in)
        w = jax.random.uniform(kw, (fan_out, fan_in), jnp.float32, -bound, bound)
        b = jax.random.uniform(kb, (fan_out,), jnp.float32, -bound, bound)
        return w, b

    user_tab = jax.random.normal(ks[0], (number_of_user + 1, E), jnp.float32)
    item_tab = jax.random.normal(ks[1], (number_of_item + 1, E), jnp.float32)
    wu, bu = linear(ks[2], E + UF, E)      # user_feature_layer
    wi, bi = linear(ks[3], E + IF, E)      # item_feature_layer
    w1, b1 = linear(ks[4], 2 * E, H)       # layer1
    w2, b2 = linear(ks[5], H, 1)           # layer2

    # Block-diagonal / zero-padded weights laid out for the kernel's packed
    # [u_emb | i_emb] input and [user_hidden | item_hidden] output.
    w_e = jnp.zeros((2 * E, 2 * E), jnp.float32)
    w_e = w_e.at[:E, :E].set(wu[:, :E].T).at[E:, E:].set(wi[:, :E].T)
    w_uf = jnp.zeros((UF, 2 * E), jnp.float32).at[:, :E].set(wu[:, E:].T)
    w_if = jnp.zeros((IF, 2 * E), jnp.float32).at[:, E:].set(wi[:, E:].T)

    return {
        # f32 originals (used by the literal reference implementation)
        "user_emb_table_f32": user_tab, "item_emb_table_f32": item_tab,
        "wu": wu, "bu": bu, "wi": wi, "bi": bi,
        "w1": w1, "b1_vec": b1, "w2": w2, "b2_vec": b2,
        # Kernel-side packed / cast parameters.
        # NOTE: the fused embedding table is stored bf16, so the residual add
        # in the kernel uses the bf16-quantized embedding (the PyTorch model
        # adds f32).  ~0.4% relative quantization; keep the tables f32 if
        # tighter accuracy is required.
        "emb_table": jnp.concatenate([user_tab, item_tab], axis=0).astype(bf16),
        "item_offset": jnp.int32(number_of_user + 1),
        "w_e": w_e.astype(bf16),                         # [2E, 2E]
        "w_uf": w_uf.astype(bf16),                       # [UF, 2E]
        "w_if": w_if.astype(bf16),                       # [IF, 2E]
        "b_ui": jnp.concatenate([bu, bi]).reshape(1, 2 * E),   # f32
        "w1_packed": w1.T.astype(bf16),                  # [2E, H]
        "b1": b1.reshape(1, H),                          # f32
        "w2_col": w2.T.astype(bf16),                     # [H, 1]
        "b2": b2.reshape(1, 1),                          # f32
    }


# -----------------------------------------------------------------------------
# Pure-JAX f32 reference (mirrors the PyTorch forward literally, with concats)
# -----------------------------------------------------------------------------
def reference_forward(user_id, item_id, user_features, item_features, params):
    p = params
    u_emb = jnp.take(p["user_emb_table_f32"], user_id, axis=0)
    i_emb = jnp.take(p["item_emb_table_f32"], item_id, axis=0)
    uh = jax.nn.relu(jnp.concatenate([u_emb, user_features], axis=1)) @ p["wu"].T + p["bu"]
    uh = uh + u_emb
    ih = jax.nn.relu(jnp.concatenate([i_emb, item_features], axis=1)) @ p["wi"].T + p["bi"]
    ih = ih + i_emb
    h = jax.nn.relu(jnp.concatenate([uh, ih], axis=1)) @ p["w1"].T + p["b1_vec"]
    h = jax.nn.relu(h)
    return h @ p["w2"].T + p["b2_vec"]


if __name__ == "__main__":
    # Module-default feature widths, small tables / batch for the demo.
    number_of_user = 300
    number_of_item = 300
    user_feature_size = 21
    item_feature_size = 39
    embedding_size = 50
    n_hidden = 20
    batch = 400          # not a multiple of the tile: exercises padding + grid

    key = jax.random.PRNGKey(0)
    kp, ku, ki, kuf, kif = jax.random.split(key, 5)
    params = init_params(kp, number_of_user, number_of_item,
                         user_feature_size, item_feature_size,
                         embedding_size, n_hidden)

    user_id = jax.random.randint(ku, (batch,), 0, number_of_user + 1, dtype=jnp.int32)
    item_id = jax.random.randint(ki, (batch,), 0, number_of_item + 1, dtype=jnp.int32)
    user_features = jax.random.normal(kuf, (batch, user_feature_size), jnp.float32)
    item_features = jax.random.normal(kif, (batch, item_feature_size), jnp.float32)

    # block_batch=128 here only to exercise the multi-step grid + row-padding
    # path at this tiny demo batch; do NOT benchmark with small tiles — the
    # production default is 4096 (8192 on v6e).
    fwd = jax.jit(functools.partial(hybrid_rec_forward, block_batch=128))
    out = jax.block_until_ready(fwd(user_id, item_id, user_features,
                                    item_features, params))

    ref = reference_forward(user_id, item_id, user_features, item_features, params)
    assert out.shape == (batch, 1)
    max_err = float(jnp.max(jnp.abs(out - ref)))
    assert jnp.allclose(out, ref, atol=3e-2, rtol=3e-2), \
        f"mismatch vs reference (max abs err {max_err})"

    print("KERNEL_OK")
</pallas_src>

<mosaic_0001>
module attributes {stable_mosaic.version = 11 : i64} {
  func.func @hybrid_rec_kernel(%arg0: i32, %arg1: memref<128x100xbf16, #tpu.memory_space<vmem>>, %arg2: memref<128x21xf32, #tpu.memory_space<vmem>>, %arg3: memref<128x39xf32, #tpu.memory_space<vmem>>, %arg4: memref<100x100xbf16, #tpu.memory_space<vmem>>, %arg5: memref<21x100xbf16, #tpu.memory_space<vmem>>, %arg6: memref<39x100xbf16, #tpu.memory_space<vmem>>, %arg7: memref<1x100xf32, #tpu.memory_space<vmem>>, %arg8: memref<100x20xbf16, #tpu.memory_space<vmem>>, %arg9: memref<1x20xf32, #tpu.memory_space<vmem>>, %arg10: memref<20x1xbf16, #tpu.memory_space<vmem>>, %arg11: memref<1x1xf32, #tpu.memory_space<vmem>>, %arg12: memref<128x1xf32, #tpu.memory_space<vmem>>) attributes {dimension_semantics = [#tpu.dimension_semantics<parallel>], iteration_bounds = array<i64: 4>, scalar_prefetch = 0 : i64, scratch_operands = 0 : i64, tpu.core_type = #tpu.core_type<tc>, window_params = [{transform_indices = @transform_0, window_bounds = array<i64: 128, 100>}, {transform_indices = @transform_1, window_bounds = array<i64: 128, 21>}, {transform_indices = @transform_2, window_bounds = array<i64: 128, 39>}, {pipeline_mode = #tpu.pipeline_mode<synchronous>, transform_indices = @transform_3, window_bounds = array<i64: 100, 100>}, {pipeline_mode = #tpu.pipeline_mode<synchronous>, transform_indices = @transform_4, window_bounds = array<i64: 21, 100>}, {pipeline_mode = #tpu.pipeline_mode<synchronous>, transform_indices = @transform_5, window_bounds = array<i64: 39, 100>}, {pipeline_mode = #tpu.pipeline_mode<synchronous>, transform_indices = @transform_6, window_bounds = array<i64: 1, 100>}, {pipeline_mode = #tpu.pipeline_mode<synchronous>, transform_indices = @transform_7, window_bounds = array<i64: 100, 20>}, {pipeline_mode = #tpu.pipeline_mode<synchronous>, transform_indices = @transform_8, window_bounds = array<i64: 1, 20>}, {pipeline_mode = #tpu.pipeline_mode<synchronous>, transform_indices = @transform_9, window_bounds = array<i64: 20, 1>}, {pipeline_mode = #tpu.pipeline_mode<synchronous>, transform_indices = @transform_10, window_bounds = array<i64: 1, 1>}, {transform_indices = @transform_11, window_bounds = array<i64: 128, 1>}]} {
    %c0 = arith.constant 0 : index
    %c0_0 = arith.constant 0 : index
    %0 = vector.load %arg1[%c0, %c0_0] : memref<128x100xbf16, #tpu.memory_space<vmem>>, vector<128x100xbf16>
    %cst = arith.constant 0.000000e+00 : bf16
    %1 = vector.broadcast %cst : bf16 to vector<128x100xbf16>
    %2 = arith.maximumf %0, %1 : vector<128x100xbf16>
    %c0_1 = arith.constant 0 : index
    %c0_2 = arith.constant 0 : index
    %3 = vector.load %arg4[%c0_1, %c0_2] : memref<100x100xbf16, #tpu.memory_space<vmem>>, vector<100x100xbf16>
    %cst_3 = arith.constant dense<0.000000e+00> : vector<128x100xf32>
    %4 = tpu.matmul %2, %3, %cst_3 {dimension_numbers = #tpu.dot_dimension_numbers<[1], [0], [0], [1], [0, 0, 1, 1], [], []>} : vector<128x100xbf16>, vector<100x100xbf16>, vector<128x100xf32> -> vector<128x100xf32>
    %c0_4 = arith.constant 0 : index
    %c0_5 = arith.constant 0 : index
    %5 = vector.load %arg2[%c0_4, %c0_5] : memref<128x21xf32, #tpu.memory_space<vmem>>, vector<128x21xf32>
    %cst_6 = arith.constant 0.000000e+00 : f32
    %6 = vector.broadcast %cst_6 : f32 to vector<128x21xf32>
    %7 = arith.maximumf %5, %6 : vector<128x21xf32>
    %8 = arith.truncf %7 : vector<128x21xf32> to vector<128x21xbf16>
    %c0_7 = arith.constant 0 : index
    %c0_8 = arith.constant 0 : index
    %9 = vector.load %arg5[%c0_7, %c0_8] : memref<21x100xbf16, #tpu.memory_space<vmem>>, vector<21x100xbf16>
    %cst_9 = arith.constant dense<0.000000e+00> : vector<128x100xf32>
    %10 = tpu.matmul %8, %9, %cst_9 {dimension_numbers = #tpu.dot_dimension_numbers<[1], [0], [0], [1], [0, 0, 1, 1], [], []>} : vector<128x21xbf16>, vector<21x100xbf16>, vector<128x100xf32> -> vector<128x100xf32>
    %11 = arith.addf %4, %10 : vector<128x100xf32>
    %c0_10 = arith.constant 0 : index
    %c0_11 = arith.constant 0 : index
    %12 = vector.load %arg3[%c0_10, %c0_11] : memref<128x39xf32, #tpu.memory_space<vmem>>, vector<128x39xf32>
    %cst_12 = arith.constant 0.000000e+00 : f32
    %13 = vector.broadcast %cst_12 : f32 to vector<128x39xf32>
    %14 = arith.maximumf %12, %13 : vector<128x39xf32>
    %15 = arith.truncf %14 : vector<128x39xf32> to vector<128x39xbf16>
    %c0_13 = arith.constant 0 : index
    %c0_14 = arith.constant 0 : index
    %16 = vector.load %arg6[%c0_13, %c0_14] : memref<39x100xbf16, #tpu.memory_space<vmem>>, vector<39x100xbf16>
    %cst_15 = arith.constant dense<0.000000e+00> : vector<128x100xf32>
    %17 = tpu.matmul %15, %16, %cst_15 {dimension_numbers = #tpu.dot_dimension_numbers<[1], [0], [0], [1], [0, 0, 1, 1], [], []>} : vector<128x39xbf16>, vector<39x100xbf16>, vector<128x100xf32> -> vector<128x100xf32>
    %18 = arith.addf %11, %17 : vector<128x100xf32>
    %c0_16 = arith.constant 0 : index
    %c0_17 = arith.constant 0 : index
    %19 = vector.load %arg7[%c0_16, %c0_17] : memref<1x100xf32, #tpu.memory_space<vmem>>, vector<1x100xf32>
    %20 = vector.broadcast %19 : vector<1x100xf32> to vector<128x100xf32>
    %21 = arith.addf %18, %20 : vector<128x100xf32>
    %22 = arith.extf %0 : vector<128x100xbf16> to vector<128x100xf32>
    %23 = arith.addf %21, %22 : vector<128x100xf32>
    %cst_18 = arith.constant 0.000000e+00 : f32
    %24 = vector.broadcast %cst_18 : f32 to vector<128x100xf32>
    %25 = arith.maximumf %23, %24 : vector<128x100xf32>
    %26 = arith.truncf %25 : vector<128x100xf32> to vector<128x100xbf16>
    %c0_19 = arith.constant 0 : index
    %c0_20 = arith.constant 0 : index
    %27 = vector.load %arg8[%c0_19, %c0_20] : memref<100x20xbf16, #tpu.memory_space<vmem>>, vector<100x20xbf16>
    %cst_21 = arith.constant dense<0.000000e+00> : vector<128x20xf32>
    %28 = tpu.matmul %26, %27, %cst_21 {dimension_numbers = #tpu.dot_dimension_numbers<[1], [0], [0], [1], [0, 0, 1, 1], [], []>} : vector<128x100xbf16>, vector<100x20xbf16>, vector<128x20xf32> -> vector<128x20xf32>
    %c0_22 = arith.constant 0 : index
    %c0_23 = arith.constant 0 : index
    %29 = vector.load %arg9[%c0_22, %c0_23] : memref<1x20xf32, #tpu.memory_space<vmem>>, vector<1x20xf32>
    %30 = vector.broadcast %29 : vector<1x20xf32> to vector<128x20xf32>
    %31 = arith.addf %28, %30 : vector<128x20xf32>
    %cst_24 = arith.constant 0.000000e+00 : f32
    %32 = vector.broadcast %cst_24 : f32 to vector<128x20xf32>
    %33 = arith.maximumf %31, %32 : vector<128x20xf32>
    %34 = arith.truncf %33 : vector<128x20xf32> to vector<128x20xbf16>
    %c0_25 = arith.constant 0 : index
    %c0_26 = arith.constant 0 : index
    %35 = vector.load %arg10[%c0_25, %c0_26] : memref<20x1xbf16, #tpu.memory_space<vmem>>, vector<20x1xbf16>
    %cst_27 = arith.constant dense<0.000000e+00> : vector<128x1xf32>
    %36 = tpu.matmul %34, %35, %cst_27 {dimension_numbers = #tpu.dot_dimension_numbers<[1], [0], [0], [1], [0, 0, 1, 1], [], []>} : vector<128x20xbf16>, vector<20x1xbf16>, vector<128x1xf32> -> vector<128x1xf32>
    %c0_28 = arith.constant 0 : index
    %c0_29 = arith.constant 0 : index
    %37 = vector.load %arg11[%c0_28, %c0_29] : memref<1x1xf32, #tpu.memory_space<vmem>>, vector<1x1xf32>
    %38 = vector.broadcast %37 : vector<1x1xf32> to vector<128x1xf32>
    %39 = arith.addf %36, %38 : vector<128x1xf32>
    %c0_30 = arith.constant 0 : index
    %c0_31 = arith.constant 0 : index
    %40 = vector.load %arg12[%c0_30, %c0_31] : memref<128x1xf32, #tpu.memory_space<vmem>>, vector<128x1xf32>
    tpu.vector_store %arg12[%c0_30, %c0_31], %39 {strides = array<i32>} : memref<128x1xf32, #tpu.memory_space<vmem>>, vector<128x1xf32>,
    return
  }
  func.func @transform_0(%arg0: i32) -> (i32, i32) {
    %c0_i32 = arith.constant 0 : i32
    %c0_i32_0 = arith.constant 0 : i32
    return %arg0, %c0_i32 : i32, i32
  }
  func.func @transform_1(%arg0: i32) -> (i32, i32) {
    %c0_i32 = arith.constant 0 : i32
    %c0_i32_0 = arith.constant 0 : i32
    return %arg0, %c0_i32 : i32, i32
  }
  func.func @transform_2(%arg0: i32) -> (i32, i32) {
    %c0_i32 = arith.constant 0 : i32
    %c0_i32_0 = arith.constant 0 : i32
    return %arg0, %c0_i32 : i32, i32
  }
  func.func @transform_3(%arg0: i32) -> (i32, i32) {
    %c0_i32 = arith.constant 0 : i32
    %c0_i32_0 = arith.constant 0 : i32
    %c0_i32_1 = arith.constant 0 : i32
    return %c0_i32, %c0_i32_0 : i32, i32
  }
  func.func @transform_4(%arg0: i32) -> (i32, i32) {
    %c0_i32 = arith.constant 0 : i32
    %c0_i32_0 = arith.constant 0 : i32
    %c0_i32_1 = arith.constant 0 : i32
    return %c0_i32, %c0_i32_0 : i32, i32
  }
  func.func @transform_5(%arg0: i32) -> (i32, i32) {
    %c0_i32 = arith.constant 0 : i32
    %c0_i32_0 = arith.constant 0 : i32
    %c0_i32_1 = arith.constant 0 : i32
    return %c0_i32, %c0_i32_0 : i32, i32
  }
  func.func @transform_6(%arg0: i32) -> (i32, i32) {
    %c0_i32 = arith.constant 0 : i32
    %c0_i32_0 = arith.constant 0 : i32
    %c0_i32_1 = arith.constant 0 : i32
    return %c0_i32, %c0_i32_0 : i32, i32
  }
  func.func @transform_7(%arg0: i32) -> (i32, i32) {
    %c0_i32 = arith.constant 0 : i32
    %c0_i32_0 = arith.constant 0 : i32
    %c0_i32_1 = arith.constant 0 : i32
    return %c0_i32, %c0_i32_0 : i32, i32
  }
  func.func @transform_8(%arg0: i32) -> (i32, i32) {
    %c0_i32 = arith.constant 0 : i32
    %c0_i32_0 = arith.constant 0 : i32
    %c0_i32_1 = arith.constant 0 : i32
    return %c0_i32, %c0_i32_0 : i32, i32
  }
  func.func @transform_9(%arg0: i32) -> (i32, i32) {
    %c0_i32 = arith.constant 0 : i32
    %c0_i32_0 = arith.constant 0 : i32
    %c0_i32_1 = arith.constant 0 : i32
    return %c0_i32, %c0_i32_0 : i32, i32
  }
  func.func @transform_10(%arg0: i32) -> (i32, i32) {
    %c0_i32 = arith.constant 0 : i32
    %c0_i32_0 = arith.constant 0 : i32
    %c0_i32_1 = arith.constant 0 : i32
    return %c0_i32, %c0_i32_0 : i32, i32
  }
  func.func @transform_11(%arg0: i32) -> (i32, i32) {
    %c0_i32 = arith.constant 0 : i32
    %c0_i32_0 = arith.constant 0 : i32
    return %arg0, %c0_i32 : i32, i32
  }
}

</mosaic_0001>

<bundles_post_ra>
// kernel: hybrid_rec_forward.1
= control target key start
LH: loop header
LB: loop body
LE: loop exit
PB: predicated region body
PF: predicated region fallthrough
CT: control target
= control target key end

     0   :  { %s2007_s19 = smov 0   ;;  %s2345_s0 = inlined_call_operand.vmem [shape: bf16[512,100], index: 0, kind: input, shape index: {}]   ;;  %s2346_s1 = inlined_call_operand.vmem [shape: f32[512,21], index: 1, kind: input, shape index: {}]   ;;  %s2347_s2 = inlined_call_operand.vmem [shape: f32[512,39], index: 2, kind: input, shape index: {}]   ;;  %s2348_s3 = inlined_call_operand.vmem [shape: bf16[100,100], index: 3, kind: input, shape index: {}]   ;;  %s2349_s4 = inlined_call_operand.vmem [shape: bf16[21,100], index: 4, kind: input, shape index: {}]   ;;  %s2350_s5 = inlined_call_operand.vmem [shape: bf16[39,100], index: 5, kind: input, shape index: {}]   ;;  %s2351_s6 = inlined_call_operand.vmem [shape: f32[1,100], index: 6, kind: input, shape index: {}]   ;;  %s2352_s7 = inlined_call_operand.vmem [shape: bf16[100,20], index: 7, kind: input, shape index: {}]   ;;  %s2353_s8 = inlined_call_operand.vmem [shape: f32[1,20], index: 8, kind: input, shape index: {}]   ;;  %s2354_s9 = inlined_call_operand.vmem [shape: bf16[20,1], index: 9, kind: input, shape index: {}]   ;;  %s2355_s10 = inlined_call_operand.<no memory space> [shape: f32[1,1], index: 10, kind: input, shape index: {}]   ;;  %s2356_s11 = inlined_call_operand.vmem [shape: f32[512,1], index: 11, kind: output, shape index: {}]  }
   0x1   :  { %v16_v0 = vstv %s2355_s10 }
   0x2   :  { %17 = vst [vmem:[#allocation2] sm:$0x1] %v16_v0 }
   0x3 LB: > { %s1598_s20 = sadd.s32 4294967295, %s1940_s19   ;;  %p1602_p0 = scmp.ge.s32.totalorder %s1940_s19, 1  ;;  %s1940_s19 = sphi %s2007_s19, %s23_s19  }
   0x4   : > { %p362_p1 = scmp.lt.s32.totalorder %s1940_s19, 5 }
   0x6   : > { %p363_p2 = pnand %p1602_p0, %p362_p1 }
   0x7   : > { %v1913_v1 = vld [vmem:[%s2349_s4] sm:$0xff] (!%p363_p2)   ;;  %vm559_vm0 = vcmask (!%p363_p2), 1041408   ;;  %v1914_v2 = vld [vmem:[%s2349_s4 + $0x8] ss:$0 sps:$4 sm:$0x77] (!%p363_p2)   ;;  %vm560_vm1 = vcmask (!%p363_p2), 1042432  }
   0x8   : > { %366 = sbr.rel (%p363_p2) target bundleno = 776 (0x308), region = 64  ;;  %1746 = vmatprep.subr.bf16.mxu0 (!%p363_p2), %v1913_v1  ;;  %s1603_s24 = sshll.u32 (!%p363_p2), %s1598_s20, 4  ;;  %v1942_v3 = vmov (!%p363_p2), 65535   ;;  %v1915_v7 = vld [vmem:[%s2348_s3] sm:$0xff] (!%p363_p2)   ;;  %vm534_vm2 = vcmask (!%p363_p2), 171008   ;;  %v1916_v24 = vld [vmem:[%s2348_s3 + $0x8] sm:$0xff] (!%p363_p2)  }
   0x9   : > { %1747 = vmatpush3.bf16.msra.mxu0 (!%p363_p2), %v1913_v1  ;;  %v561_v4 = vsel (!%p363_p2), %vm559_vm0, 4294967295, %v1942_v3  ;;  %p413_p3 = scmp.lt.s32.totalorder (!%p363_p2), %s1603_s24, 63  ;;  %v1917_v32 = vld [vmem:[%s2348_s3 + $0x10] sm:$0xff] (!%p363_p2)   ;;  %v1918_v34 = vld [vmem:[%s2348_s3 + $0x18] sm:$0xff] (!%p363_p2)   ;;  %v1919_v44 = vld [vmem:[%s2348_s3 + $0x20] sm:$0xff] (!%p363_p2)   ;;  %v1943_v57 = vmov (!%p363_p2), 0  }
   0xa   : > { %v562_v5 = vsel (!%p363_p2), %vm560_vm1, %v561_v4, 0  ;;  %v1920_v46 = vld [vmem:[%s2348_s3 + $0x28] sm:$0xff] (!%p363_p2)   ;;  %v1925_v52 = vld [vmem:[%s2352_s7] sm:$0xff] (!%p363_p2)   ;;  %v1921_v55 = vld [vmem:[%s2348_s3 + $0x30] ss:$0 sps:$4 sm:$0x33] (!%p363_p2)  }
   0xb   : > { %v564_v6 = vand.u32 (!%p363_p2), %v1914_v2, %v562_v5  ;;  %1818 = vmatprep.subr.bf16.mxu1 (!%p363_p2), %v1925_v52  ;;  %v1926_v56 = vld [vmem:[%s2352_s7 + $0x8] sm:$0xff] (!%p363_p2)   ;;  %v1927_v60 = vld [vmem:[%s2352_s7 + $0x10] sm:$0xff] (!%p363_p2)   ;;  %vm742_vm3 = vcmask (!%p363_p2), 818176   ;;  %v768_v1 = vsel (!%p363_p2), %vm559_vm0, %v1921_v55, 0  ;;  %v1922_v2 = vld [vmem:[%s2350_s5] sm:$0xff] (!%p363_p2)   ;;  %vm952_vm4 = vcmask (!%p363_p2), 1043456  }
   0xc   : > { %1819 = vmatpush3.bf16.msra.mxu1 (!%p363_p2), %v1925_v52  ;;  %vm927_vm5 = vcmask (!%p363_p2), 318464   ;;  %vm1376_vm6 = vcmask (!%p363_p2), 162816   ;;  %vm1501_vm7 = vcmask (!%p363_p2), 7168  }
   0xd   : > { %1748 = vmatprep.subr.bf16.mxu0 (!%p363_p2), %v564_v6  ;;  %1820 = vmatprep.subr.bf16.mxu1 (!%p363_p2), %v1926_v56 }
   0xe   : > { %1749 = vmatpush3.bf16.msra.mxu0 (!%p363_p2), %v564_v6  ;;  %v1928_v6 = vld [vmem:[%s2352_s7 + $0x18] sm:$0xff] (!%p363_p2)  }
   0xf   : > { %s2358_s24 = smov (!%p413_p3, %s1603_s24), 63  ;;  %1766 = vmatprep.subr.bf16.mxu0 %v1915_v7 }
  0x10   : > { %s2030_s27 = sshll.u32 %s2358_s24, 3  ;;  %s1604_s18 = sshll.u32 %s2358_s24, 2  ;;  %1821 = vmatpush3.bf16.msra.mxu1 %v1926_v56 }
  0x11   : > { %s2036_s30 = scalar_lea.vmem %s2346_s1, %s2030_s27  ;;  %s2070_s22 = scalar_lea.vmem %s2345_s0, %s1604_s18  ;;  %1822 = vmatprep.subr.bf16.mxu1 %v1927_v60 }
  0x12   : > { %v482_v8 = vld [vmem:[%s2036_s30] sm:$0xff]  ;;  %v483_v9 = vld [vmem:[%s2036_s30 + $0x8] sm:$0xff]  ;;  %v484_v10 = vld [vmem:[%s2036_s30 + $0x10] sm:$0xff]  ;;  %s2190_s28 = scalar_lea.vmem %s2347_s2, %s2030_s27  ;;  %s2308_s26 = scalar_lea.vmem %s2356_s11, %s2030_s27 }
  0x13   : > { %v498_v11 = vmax.f32 %v482_v8, 0.0  ;;  %v499_v12 = vmax.f32 %v483_v9, 0.0  ;;  %v485_v13 = vld [vmem:[%s2036_s30 + $0x18] sm:$0xff]  ;;  %v500_v14 = vmax.f32 %v484_v10, 0.0  ;;  %v486_v15 = vld [vmem:[%s2036_s30 + $0x20] sm:$0xff]  ;;  %v487_v16 = vld [vmem:[%s2036_s30 + $0x28] sm:$0xff] }
  0x14   : > { %v501_v17 = vmax.f32 %v485_v13, 0.0  ;;  %v502_v18 = vmax.f32 %v486_v15, 0.0  ;;  %v503_v19 = vmax.f32 %v487_v16, 0.0  ;;  %v488_v21 = vld [vmem:[%s2036_s30 + $0x30] sm:$0xff]  ;;  %v489_v22 = vld [vmem:[%s2036_s30 + $0x38] sm:$0xff]  ;;  %v490_v26 = vld [vmem:[%s2036_s30 + $0x40] sm:$0xff]  ;;  %1823 = vmatpush3.bf16.msra.mxu1 %v1927_v60 }
  0x15   : > { %v514_v20 = vpack.c.bf16 %v499_v12, %v498_v11  ;;  %v491_v27 = vld [vmem:[%s2036_s30 + $0x48] sm:$0xff]  ;;  %v504_v28 = vmax.f32 %v488_v21, 0.0  ;;  %v505_v29 = vmax.f32 %v489_v22, 0.0  ;;  %v506_v30 = vmax.f32 %v490_v26, 0.0  ;;  %v492_v36 = vld [vmem:[%s2036_s30 + $0x50] sm:$0xff]  ;;  %v493_v37 = vld [vmem:[%s2036_s30 + $0x58] sm:$0xff]  ;;  %1824 = vmatprep.subr.bf16.mxu1 %v1928_v6 }
  0x16   : > { %v515_v23 = vpack.c.bf16 %v501_v17, %v500_v14  ;;  %v516_v25 = vpack.c.bf16 %v503_v19, %v502_v18  ;;  %v507_v31 = vmax.f32 %v491_v27, 0.0  ;;  %v494_v38 = vld [vmem:[%s2036_s30 + $0x60] sm:$0xff]  ;;  %v495_v39 = vld [vmem:[%s2036_s30 + $0x68] sm:$0xff]  ;;  %v508_v40 = vmax.f32 %v492_v36, 0.0  ;;  %v496_v47 = vld [vmem:[%s2036_s30 + $0x70] sm:$0xff] }
  0x17   : > { %1750 = vmatprep.mubr.msk.bf16.mxu0 %vm534_vm2, %v514_v20  ;;  %v517_v33 = vpack.c.bf16 %v505_v29, %v504_v28  ;;  %v509_v41 = vmax.f32 %v493_v37, 0.0  ;;  %v510_v42 = vmax.f32 %v494_v38, 0.0  ;;  %v511_v43 = vmax.f32 %v495_v39, 0.0  ;;  %v497_v49 = vld [vmem:[%s2036_s30 + $0x78] sm:$0xff]  ;;  %v2081_v50 = vld [vmem:[%s2070_s22] sm:$0xf] }
  0x18   : > { %1751 = vmatmul.mubr.msk.bf16.vlgmr.msra.gmra.mrb[0].mxu0 %vm534_vm2, %v515_v23  ;;  %v518_v35 = vpack.c.bf16 %v507_v31, %v506_v30  ;;  %v2084_v51 = vld [vmem:[%s2070_s22 + $0x4] sm:$0xf]  ;;  %v512_v53 = vmax.f32 %v496_v47, 0.0  ;;  %v513_v54 = vmax.f32 %v497_v49, 0.0  ;;  %v453_v58 = vmax.bf16 %v1943_v57, %v2081_v50  ;;  %v2105_v63 = vld [vmem:[%s2070_s22 + $0x8] sm:$0xf]  ;;  %1825 = vmatpush3.bf16.msra.mxu1 %v1928_v6 }
  0x19   : > { %1767 = vmatpush3.bf16.msra.mxu0 %v1915_v7  ;;  %1754 = vmatprep.mubr.msk.bf16.mxu0 %vm534_vm2, %v516_v25  ;;  %v519_v45 = vpack.c.bf16 %v509_v41, %v508_v40  ;;  %v520_v48 = vpack.c.bf16 %v511_v43, %v510_v42  ;;  %v454_v59 = vmax.bf16 %v1943_v57, %v2084_v51  ;;  %v2108_v0 = vld [vmem:[%s2070_s22 + $0xc] sm:$0xf]  ;;  %v2116_v4 = vld [vmem:[%s2070_s22 + $0x10] sm:$0xf]  ;;  %v2119_v5 = vld [vmem:[%s2070_s22 + $0x14] sm:$0xf] }
  0x1a   : > { %1768 = vmatprep.subr.bf16.mxu0 %v1916_v24  ;;  %v521_v61 = vpack.c.bf16 %v513_v54, %v512_v53  ;;  %v455_v7 = vmax.bf16 %v1943_v57, %v2105_v63  ;;  %v456_v8 = vmax.bf16 %v1943_v57, %v2108_v0  ;;  %v457_v9 = vmax.bf16 %v1943_v57, %v2116_v4  ;;  %v2137_v14 = vld [vmem:[%s2070_s22 + $0x18] sm:$0xf]  ;;  %v2140_v15 = vld [vmem:[%s2070_s22 + $0x1c] sm:$0xf]  ;;  %v1923_v16 = vld [vmem:[%s2350_s5 + $0x8] sm:$0xff]  }
  0x1b   : > { %v1621_v62 = vcombine.low %v453_v58, %v454_v59  ;;  %v458_v10 = vmax.bf16 %v1943_v57, %v2119_v5  ;;  %v953_v12 = vsel %vm560_vm1, 4294967295, %v1942_v3  ;;  %v2146_v17 = vld [vmem:[%s2070_s22 + $0x20] sm:$0xf]  ;;  %v2149_v18 = vld [vmem:[%s2070_s22 + $0x24] sm:$0xf]  ;;  %v459_v20 = vmax.bf16 %v1943_v57, %v2137_v14  ;;  %v868_v40 = vld [vmem:[%s2190_s28 + $0x8] sm:$0xff] }
  0x1c   : > { %v1622_v11 = vcombine.low %v455_v7, %v456_v8  ;;  %v1924_v19 = vld [vmem:[%s2350_s5 + $0x10] ss:$0 sps:$4 sm:$0xff]   ;;  %v954_v3 = vsel %vm952_vm4, %v953_v12, 0  ;;  %v460_v21 = vmax.bf16 %v1943_v57, %v2140_v15  ;;  %v461_v22 = vmax.bf16 %v1943_v57, %v2146_v17  ;;  %v2165_v27 = vld [vmem:[%s2070_s22 + $0x28] sm:$0xf]  ;;  %v867_v39 = vld [vmem:[%s2190_s28] sm:$0xff] }
  0x1d   : > { %1769 = vmatpush3.bf16.msra.mxu0 %v1916_v24  ;;  %v1623_v13 = vcombine.low %v457_v9, %v458_v10  ;;  %v462_v23 = vmax.bf16 %v1943_v57, %v2149_v18  ;;  %v956_v24 = vand.u32 %v1924_v19, %v954_v3  ;;  %v2168_v28 = vld [vmem:[%s2070_s22 + $0x2c] sm:$0xf]  ;;  %v2171_v29 = vld [vmem:[%s2070_s22 + $0x30] sm:$0xf]  ;;  %v2174_v30 = vld [vmem:[%s2070_s22 + $0x34] sm:$0xf]  ;;  %v463_v31 = vmax.bf16 %v1943_v57, %v2165_v27 }
  0x1e   : > { %1770 = vmatprep.subr.bf16.mxu0 %v1917_v32  ;;  %v1624_v25 = vcombine.low %v459_v20, %v460_v21  ;;  %v2193_v37 = vld [vmem:[%s2070_s22 + $0x38] sm:$0xf]  ;;  %v2196_v38 = vld [vmem:[%s2070_s22 + $0x3c] sm:$0xf]  ;;  %v883_v43 = vmax.f32 %v867_v39, 0.0  ;;  %v869_v47 = vld [vmem:[%s2190_s28 + $0x10] sm:$0xff] }
  0x1f   : > { %v1625_v26 = vcombine.low %v461_v22, %v462_v23  ;;  %v467_v41 = vmax.bf16 %v1943_v57, %v2193_v37  ;;  %v468_v42 = vmax.bf16 %v1943_v57, %v2196_v38  ;;  %v871_v49 = vld [vmem:[%s2190_s28 + $0x20] sm:$0xff]  ;;  %v872_v52 = vld [vmem:[%s2190_s28 + $0x28] sm:$0xff]  ;;  %v885_v53 = vmax.f32 %v869_v47, 0.0  ;;  %v873_v59 = vld [vmem:[%s2190_s28 + $0x30] sm:$0xff] }
  0x20   : > { %1755 = vmatmul.mubr.msk.bf16.gmra.mrb[4].mxu0 %vm534_vm2, %v517_v33  ;;  %v465_v33 = vmax.bf16 %v1943_v57, %v2171_v29  ;;  %v888_v56 = vmax.f32 %v872_v52, 0.0  ;;  %v874_v60 = vld [vmem:[%s2190_s28 + $0x38] sm:$0xff]  ;;  %v877_v10 = vld [vmem:[%s2190_s28 + $0x50] sm:$0xff]  ;;  %v879_v12 = vld [vmem:[%s2190_s28 + $0x60] sm:$0xff] }
  0x21   : > { %1771 = vmatpush3.bf16.msra.mxu0 %v1917_v32  ;;  %1758 = vmatprep.mubr.msk.bf16.mxu0 %vm534_vm2, %v518_v35  ;;  %v464_v32 = vmax.bf16 %v1943_v57, %v2168_v28  ;;  %v895_v3 = vmax.f32 %v879_v12, 0.0  ;;  %v881_v23 = vld [vmem:[%s2190_s28 + $0x70] sm:$0xff]  ;;  %v2246_v39 = vld [vmem:[%s2351_s6] ss:$0 sm:$0xff] }
  0x22   : > { %1772 = vmatprep.subr.bf16.mxu0 %v1918_v34 }
  0x23   : > { %v1626_v35 = vcombine.low %v463_v31, %v464_v32  ;;  %v1929_v32 = vld [vmem:[%s2352_s7 + $0x20] sm:$0xff]  }
  0x24   : > { %1826 = vmatprep.subr.bf16.mxu1 %v1929_v32 }
  0x25   : > { %1773 = vmatpush3.bf16.msra.mxu0 %v1918_v34  ;;  %v466_v34 = vmax.bf16 %v1943_v57, %v2174_v30  ;;  %1827 = vmatpush3.bf16.msra.mxu1 %v1929_v32  ;;  %v1105_v32 = vunpack.c.l.bf16 %v2168_v28 }
  0x26   : > { %1774 = vmatprep.subr.bf16.mxu0 %v1919_v44 }
  0x27   : > { %v1627_v36 = vcombine.low %v465_v33, %v466_v34  ;;  %v1930_v33 = vld [vmem:[%s2352_s7 + $0x28] sm:$0xff]   ;;  %v1931_v34 = vld [vmem:[%s2352_s7 + $0x30] ss:$0 sps:$4 sm:$0x33]  }
  0x28   : > { %1759 = vmatmul.mubr.msk.bf16.gmra.mrb[8].mxu0 %vm534_vm2, %v519_v45  ;;  %v1628_v45 = vcombine.low %v467_v41, %v468_v42  ;;  %1828 = vmatprep.subr.bf16.mxu1 %v1930_v33  ;;  %v1094_v42 = vunpack.c.l.bf16 %v2081_v50 }
  0x29   : > { %1775 = vmatpush3.bf16.msra.mxu0 %v1919_v44  ;;  %1762 = vmatprep.mubr.msk.bf16.mxu0 %vm534_vm2, %v520_v48  ;;  %v884_v44 = vmax.f32 %v868_v40, 0.0  ;;  %v870_v48 = vld [vmem:[%s2190_s28 + $0x18] sm:$0xff]  ;;  %v1096_v40 = vunpack.c.l.bf16 %v2105_v63 }
  0x2a   : > { %1776 = vmatprep.subr.bf16.mxu0 %v1920_v46  ;;  %v886_v54 = vmax.f32 %v870_v48, 0.0  ;;  %1829 = vmatpush3.bf16.msra.mxu1 %v1930_v33  ;;  %v1095_v48 = vunpack.c.l.bf16 %v2084_v51 }
  0x2b   : > { %1901 = vmatprep.subr.msk.bf16.mxu1 %vm559_vm0, %v1931_v34 }
  0x2c   : > { %v900_v57 = vpack.c.bf16 %v886_v54, %v885_v53 }
  0x2d   : > { %1777 = vmatpush3.bf16.msra.mxu0 %v1920_v46  ;;  %v899_v46 = vpack.c.bf16 %v884_v44, %v883_v43 }
  0x2e   : > { %1900 = vmatprep.subr.msk.bf16.mxu0 %vm559_vm0, %v1921_v55  ;;  %v887_v55 = vmax.f32 %v871_v49, 0.0 }
  0x30   : > { %1763 = vmatmul.mubr.msk.bf16.gmra.mrb[12].mxu0 %vm534_vm2, %v521_v61  ;;  %v901_v58 = vpack.c.bf16 %v888_v56, %v887_v55  ;;  %v875_v61 = vld [vmem:[%s2190_s28 + $0x40] sm:$0xff] }
  0x31   : > { %1779 = vmatpush3.bf16.msra.mxu0 %v768_v1  ;;  %1780 = vmatprep.mubr.msk.bf16.mxu0 %vm742_vm3, %v1621_v62  ;;  %v876_v62 = vld [vmem:[%s2190_s28 + $0x48] sm:$0xff]  ;;  %v889_v1 = vmax.f32 %v873_v59, 0.0  ;;  %v891_v6 = vmax.f32 %v875_v61, 0.0  ;;  %v1098_v61 = vunpack.c.l.bf16 %v2116_v4 }
  0x32   : > { %1796 = vmatprep.subr.bf16.mxu0 %v1922_v2  ;;  %v892_v7 = vmax.f32 %v876_v62, 0.0  ;;  %v1933_v4 = vld [vmem:[%s2354_s9 + $0x8] ss:$0 sps:$4 sm:$0x33]  }
  0x34   : > { %v903_v9 = vpack.c.bf16 %v892_v7, %v891_v6 }
  0x38   : > { %1781 = vmatmul.mubr.msk.bf16.vlgmr.msra.gmra.mrb[0].mxu0 %vm742_vm3, %v1622_v11  ;;  %v878_v11 = vld [vmem:[%s2190_s28 + $0x58] sm:$0xff] }
  0x39   : > { %1797 = vmatpush3.bf16.msra.mxu0 %v1922_v2  ;;  %1784 = vmatprep.mubr.msk.bf16.mxu0 %vm742_vm3, %v1623_v13  ;;  %v890_v2 = vmax.f32 %v874_v60, 0.0  ;;  %v880_v13 = vld [vmem:[%s2190_s28 + $0x68] sm:$0xff]  ;;  %v894_v19 = vmax.f32 %v878_v11, 0.0 }
  0x3a   : > { %1798 = vmatprep.subr.bf16.mxu0 %v1923_v16  ;;  %v896_v20 = vmax.f32 %v880_v13, 0.0 }
  0x3b   : > { %v902_v8 = vpack.c.bf16 %v890_v2, %v889_v1  ;;  %v1101_v2 = vunpack.c.l.bf16 %v2140_v15 }
  0x3c   : > { %v905_v22 = vpack.c.bf16 %v896_v20, %v895_v3  ;;  %v1104_v3 = vunpack.c.l.bf16 %v2165_v27  ;;  %v1402_v20 = vsel %vm559_vm0, %v1933_v4, 0  ;;  %v1103_v27 = vunpack.c.l.bf16 %v2149_v18 }
  0x3d   : > { %1799 = vmatpush3.bf16.msra.mxu0 %v1923_v16  ;;  %v893_v16 = vmax.f32 %v877_v10, 0.0 }
  0x3e   : > { %1800 = vmatprep.subr.bf16.mxu0 %v956_v24 }
  0x3f   : > { %v904_v21 = vpack.c.bf16 %v894_v19, %v893_v16 }
  0x40   : > { %1785 = vmatmul.mubr.msk.bf16.gmra.mrb[4].mxu0 %vm742_vm3, %v1624_v25  ;;  %v897_v25 = vmax.f32 %v881_v23, 0.0 }
  0x41   : > { %1788 = vmatprep.mubr.msk.bf16.mxu0 %vm742_vm3, %v1625_v26  ;;  %1801 = vmatpush3.bf16.msra.mxu0 %v956_v24  ;;  %v882_v24 = vld [vmem:[%s2190_s28 + $0x78] sm:$0xff] }
  0x42   : > { %v898_v26 = vmax.f32 %v882_v24, 0.0  ;;  %v1102_v24 = vunpack.c.l.bf16 %v2146_v17 }
  0x44   : > { %v906_v31 = vpack.c.bf16 %v898_v26, %v897_v25 }
  0x48   : > { %1789 = vmatmul.mubr.msk.bf16.gmra.mrb[8].mxu0 %vm742_vm3, %v1626_v35  ;;  %v1234_v35 = vsel %vm559_vm0, %v1931_v34, 0 }
  0x49   : > { %1792 = vmatprep.mubr.msk.bf16.mxu0 %vm742_vm3, %v1627_v36  ;;  %1831 = vmatpush3.bf16.msra.mxu1 %v1234_v35  ;;  %v1932_v36 = vld [vmem:[%s2354_s9] sm:$0xff]  }
  0x4a   : > { %1848 = vmatprep.subr.bf16.mxu1 %v1932_v36 }
  0x50   : > { %1793 = vmatmul.mubr.msk.bf16.gmra.mrb[12].mxu0 %vm742_vm3, %v1628_v45  ;;  %v1097_v45 = vunpack.c.l.bf16 %v2108_v0 }
  0x51   : > { %1802 = vmatprep.mubr.msk.bf16.mxu0 %vm927_vm5, %v899_v46 }
  0x58   : > { %1803 = vmatmul.mubr.msk.bf16.vlgmr.msra.gmra.mrb[0].mxu0 %vm927_vm5, %v900_v57 }
  0x59   : > { %1806 = vmatprep.mubr.msk.bf16.mxu0 %vm927_vm5, %v901_v58  ;;  %v1100_v58 = vunpack.c.l.bf16 %v2137_v14 }
  0x60   : > { %1807 = vmatmul.mubr.msk.bf16.gmra.mrb[4].mxu0 %vm927_vm5, %v902_v8  ;;  %v1099_v8 = vunpack.c.l.bf16 %v2119_v5 }
  0x61   : > { %1810 = vmatprep.mubr.msk.bf16.mxu0 %vm927_vm5, %v903_v9 }
  0x68   : > { %1811 = vmatmul.mubr.msk.bf16.gmra.mrb[8].mxu0 %vm927_vm5, %v904_v21 }
  0x69   : > { %1814 = vmatprep.mubr.msk.bf16.mxu0 %vm927_vm5, %v905_v22 }
  0x70   : > { %1815 = vmatmul.mubr.msk.bf16.gmra.mrb[12].mxu0 %vm927_vm5, %v906_v31 }
 0x12b   : > { %v1804_v41 = vpop.f32.mrb[0].mxu0 }
 0x12c   : > { %v1080_v43 = vadd.f32 %v1804_v41, %v2246_v39  ;;  %v992_v44 = vpop.f32.mrb[1].mxu0 }
 0x12d   : > { %v1078_v46 = vadd.f32 %v2246_v39, %v992_v44  ;;  %v1805_v47 = vpop.f32.mrb[2].mxu0 }
 0x12e   : > { %v1112_v49 = vadd.f32 %v1096_v40, %v1080_v43  ;;  %v1081_v52 = vadd.f32 %v1805_v47, %v2246_v39  ;;  %v995_v53 = vpop.f32.mrb[3].mxu0 }
 0x12f   : > { %v1110_v54 = vadd.f32 %v1094_v42, %v1078_v46  ;;  %v1079_v63 = vadd.f32 %v2246_v39, %v995_v53  ;;  %v1108_v46 = vunpack.c.l.bf16 %v2193_v37 }
 0x130   : > { %v1113_v55 = vadd.f32 %v1097_v45, %v1081_v52  ;;  %v1128_v50 = vmax.f32 %v1112_v49, 0.0  ;;  %v1106_v49 = vunpack.c.l.bf16 %v2171_v29 }
 0x131   : > { %v1111_v56 = vadd.f32 %v1095_v48, %v1079_v63  ;;  %v1126_v59 = vmax.f32 %v1110_v54, 0.0  ;;  %v1109_v63 = vunpack.c.l.bf16 %v2196_v38 }
 0x132   : > { %v1129_v57 = vmax.f32 %v1113_v55, 0.0 }
 0x133   : > { %v1127_v0 = vmax.f32 %v1111_v56, 0.0  ;;  %v1808_v60 = vpop.f32.mrb[4].mxu0 }
 0x134   : > { %v1143_v62 = vpack.c.bf16 %v1129_v57, %v1128_v50  ;;  %v1084_v51 = vadd.f32 %v1808_v60, %v2246_v39  ;;  %v1008_v1 = vpop.f32.mrb[5].mxu0  ;;  %v1107_v57 = vunpack.c.l.bf16 %v2174_v30  ;;  %v1656_v30 = vld [vmem:[%s2353_s8] ss:$0 sm:$0xff] }
 0x135   : > { %v1082_v6 = vadd.f32 %v2246_v39, %v1008_v1  ;;  %v1809_v7 = vpop.f32.mrb[6].mxu0  ;;  %v1142_v9 = vpack.c.bf16 %v1127_v0, %v1126_v59 }
 0x136   : > { %v1116_v10 = vadd.f32 %v1100_v58, %v1084_v51  ;;  %v1085_v14 = vadd.f32 %v1809_v7, %v2246_v39  ;;  %v1011_v11 = vpop.f32.mrb[7].mxu0 }
 0x137   : > { %v1114_v12 = vadd.f32 %v1098_v61, %v1082_v6  ;;  %v1083_v13 = vadd.f32 %v2246_v39, %v1011_v11  ;;  %1832 = vmatprep.mubr.msk.bf16.mxu1 %vm742_vm3, %v1142_v9 }
 0x138   : > { %v1117_v15 = vadd.f32 %v1101_v2, %v1085_v14  ;;  %1833 = vmatmul.mubr.msk.bf16.vlgmr.msra.gmra.mrb[0].mxu1 %vm742_vm3, %v1143_v62  ;;  %v1132_v5 = vmax.f32 %v1116_v10, 0.0 }
 0x139   : > { %v1115_v16 = vadd.f32 %v1099_v8, %v1083_v13  ;;  %1849 = vmatpush3.bf16.msra.mxu1 %v1932_v36  ;;  %v1130_v21 = vmax.f32 %v1114_v12, 0.0 }
 0x13a   : > { %v1133_v19 = vmax.f32 %v1117_v15, 0.0  ;;  %1902 = vmatprep.subr.msk.bf16.mxu1 %vm559_vm0, %v1933_v4 }
 0x13b   : > { %v1131_v22 = vmax.f32 %v1115_v16, 0.0  ;;  %v1812_v23 = vpop.f32.mrb[8].mxu0 }
 0x13c   : > { %v1145_v25 = vpack.c.bf16 %v1133_v19, %v1132_v5  ;;  %v1088_v26 = vadd.f32 %v1812_v23, %v2246_v39  ;;  %v1024_v31 = vpop.f32.mrb[9].mxu0 }
 0x13d   : > { %v1144_v33 = vpack.c.bf16 %v1131_v22, %v1130_v21  ;;  %v1086_v34 = vadd.f32 %v2246_v39, %v1024_v31  ;;  %v1813_v35 = vpop.f32.mrb[10].mxu0  ;;  %1851 = vmatpush3.bf16.msra.mxu1 %v1402_v20 }
 0x13e   : > { %v1120_v36 = vadd.f32 %v1104_v3, %v1088_v26  ;;  %v1089_v40 = vadd.f32 %v1813_v35, %v2246_v39  ;;  %v1027_v41 = vpop.f32.mrb[11].mxu0 }
 0x13f   : > { %v1118_v42 = vadd.f32 %v1102_v24, %v1086_v34  ;;  %v1087_v17 = vadd.f32 %v2246_v39, %v1027_v41  ;;  %1836 = vmatprep.mubr.msk.bf16.mxu1 %vm742_vm3, %v1144_v33 }
 0x140   : > { %v1121_v43 = vadd.f32 %v1105_v32, %v1089_v40  ;;  %1837 = vmatmul.mubr.msk.bf16.gmra.mrb[4].mxu1 %vm742_vm3, %v1145_v25  ;;  %v1136_v44 = vmax.f32 %v1120_v36, 0.0 }
 0x141   : > { %v1119_v28 = vadd.f32 %v1103_v27, %v1087_v17  ;;  %v1134_v47 = vmax.f32 %v1118_v42, 0.0 }
 0x142   : > { %v1137_v45 = vmax.f32 %v1121_v43, 0.0 }
 0x143   : > { %v1135_v18 = vmax.f32 %v1119_v28, 0.0  ;;  %v1816_v48 = vpop.f32.mrb[12].mxu0 }
 0x144   : > { %v1147_v52 = vpack.c.bf16 %v1137_v45, %v1136_v44  ;;  %v1092_v53 = vadd.f32 %v1816_v48, %v2246_v39  ;;  %v1040_v54 = vpop.f32.mrb[13].mxu0 }
 0x145   : > { %v1146_v55 = vpack.c.bf16 %v1135_v18, %v1134_v47  ;;  %v1090_v56 = vadd.f32 %v2246_v39, %v1040_v54  ;;  %v1817_v50 = vpop.f32.mrb[14].mxu0 }
 0x146   : > { %v1124_v58 = vadd.f32 %v1108_v46, %v1092_v53  ;;  %v1093_v37 = vadd.f32 %v1817_v50, %v2246_v39  ;;  %v1043_v59 = vpop.f32.mrb[15].mxu0 }
 0x147   : > { %v1122_v0 = vadd.f32 %v1106_v49, %v1090_v56  ;;  %v1091_v60 = vadd.f32 %v2246_v39, %v1043_v59  ;;  %1840 = vmatprep.mubr.msk.bf16.mxu1 %vm742_vm3, %v1146_v55 }
 0x148   : > { %v1125_v29 = vadd.f32 %v1109_v63, %v1093_v37  ;;  %1841 = vmatmul.mubr.msk.bf16.gmra.mrb[8].mxu1 %vm742_vm3, %v1147_v52  ;;  %v1140_v38 = vmax.f32 %v1124_v58, 0.0 }
 0x149   : > { %v1123_v61 = vadd.f32 %v1107_v57, %v1091_v60  ;;  %v1138_v51 = vmax.f32 %v1122_v0, 0.0 }
 0x14a   : > { %v1141_v62 = vmax.f32 %v1125_v29, 0.0 }
 0x14b   : > { %v1139_v1 = vmax.f32 %v1123_v61, 0.0  ;;  %v1672_v61 = vld [vmem:[#allocation2] ss:$0 sm:$0xff] }
 0x14c   : > { %v1149_v2 = vpack.c.bf16 %v1141_v62, %v1140_v38 }
 0x14d   : > { %v1148_v6 = vpack.c.bf16 %v1139_v1, %v1138_v51 }
 0x14f   : > { %1844 = vmatprep.mubr.msk.bf16.mxu1 %vm742_vm3, %v1148_v6 }
 0x150   : > { %1845 = vmatmul.mubr.msk.bf16.gmra.mrb[12].mxu1 %vm742_vm3, %v1149_v2 }
 0x20b   : > { %v1834_v39 = vpop.f32.mrb[0].mxu1 }
 0x20c   : > { %v1279_v7 = vadd.f32 %v1834_v39, %v1656_v30  ;;  %v1270_v8 = vpop.f32.mrb[1].mxu1 }
 0x20d   : > { %v1271_v9 = vadd.f32 %v1656_v30, %v1270_v8  ;;  %v1835_v10 = vpop.f32.mrb[2].mxu1 }
 0x20e   : > { %v1282_v14 = vadd.f32 %v1835_v10, %v1656_v30  ;;  %v1273_v11 = vpop.f32.mrb[3].mxu1  ;;  %v1335_v12 = vmax.f32 %v1279_v7, 0.0 }
 0x20f   : > { %v1274_v4 = vadd.f32 %v1656_v30, %v1273_v11  ;;  %v1333_v15 = vmax.f32 %v1271_v9, 0.0 }
 0x210   : > { %v1336_v13 = vmax.f32 %v1282_v14, 0.0 }
 0x211   : > { %v1334_v16 = vmax.f32 %v1274_v4, 0.0 }
 0x212   : > { %v1350_v5 = vpack.c.bf16 %v1336_v13, %v1335_v12 }
 0x213   : > { %v1349_v19 = vpack.c.bf16 %v1334_v16, %v1333_v15  ;;  %v1838_v3 = vpop.f32.mrb[4].mxu1 }
 0x214   : > { %v1295_v20 = vadd.f32 %v1838_v3, %v1656_v30  ;;  %v1286_v21 = vpop.f32.mrb[5].mxu1 }
 0x215   : > { %v1287_v22 = vadd.f32 %v1656_v30, %v1286_v21  ;;  %v1839_v23 = vpop.f32.mrb[6].mxu1  ;;  %1852 = vmatprep.mubr.msk.bf16.mxu1 %vm1376_vm6, %v1349_v19 }
 0x216   : > { %v1298_v24 = vadd.f32 %v1839_v23, %v1656_v30  ;;  %v1289_v25 = vpop.f32.mrb[7].mxu1  ;;  %1853 = vmatmul.mubr.msk.bf16.vlgmr.msra.gmra.mrb[16].mxu1 %vm1376_vm6, %v1350_v5  ;;  %v1339_v31 = vmax.f32 %v1295_v20, 0.0 }
 0x217   : > { %v1290_v26 = vadd.f32 %v1656_v30, %v1289_v25  ;;  %v1337_v33 = vmax.f32 %v1287_v22, 0.0 }
 0x218   : > { %v1340_v32 = vmax.f32 %v1298_v24, 0.0 }
 0x219   : > { %v1338_v34 = vmax.f32 %v1290_v26, 0.0 }
 0x21a   : > { %v1352_v35 = vpack.c.bf16 %v1340_v32, %v1339_v31 }
 0x21b   : > { %v1351_v27 = vpack.c.bf16 %v1338_v34, %v1337_v33  ;;  %v1842_v36 = vpop.f32.mrb[8].mxu1 }
 0x21c   : > { %v1311_v40 = vadd.f32 %v1842_v36, %v1656_v30  ;;  %v1302_v41 = vpop.f32.mrb[9].mxu1 }
 0x21d   : > { %v1303_v42 = vadd.f32 %v1656_v30, %v1302_v41  ;;  %v1843_v17 = vpop.f32.mrb[10].mxu1  ;;  %1856 = vmatprep.mubr.msk.bf16.mxu1 %vm1376_vm6, %v1351_v27 }
 0x21e   : > { %v1314_v43 = vadd.f32 %v1843_v17, %v1656_v30  ;;  %v1305_v28 = vpop.f32.mrb[11].mxu1  ;;  %1857 = vmatmul.mubr.msk.bf16.gmra.mrb[20].mxu1 %vm1376_vm6, %v1352_v35  ;;  %v1343_v45 = vmax.f32 %v1311_v40, 0.0 }
 0x21f   : > { %v1306_v44 = vadd.f32 %v1656_v30, %v1305_v28  ;;  %v1341_v47 = vmax.f32 %v1303_v42, 0.0 }
 0x220   : > { %v1344_v46 = vmax.f32 %v1314_v43, 0.0 }
 0x221   : > { %v1342_v18 = vmax.f32 %v1306_v44, 0.0 }
 0x222   : > { %v1354_v48 = vpack.c.bf16 %v1344_v46, %v1343_v45 }
 0x223   : > { %v1353_v49 = vpack.c.bf16 %v1342_v18, %v1341_v47  ;;  %v1846_v52 = vpop.f32.mrb[12].mxu1 }
 0x224   : > { %v1327_v53 = vadd.f32 %v1846_v52, %v1656_v30  ;;  %v1318_v54 = vpop.f32.mrb[13].mxu1 }
 0x225   : > { %v1319_v63 = vadd.f32 %v1656_v30, %v1318_v54  ;;  %v1847_v55 = vpop.f32.mrb[14].mxu1  ;;  %1860 = vmatprep.mubr.msk.bf16.mxu1 %vm1376_vm6, %v1353_v49 }
 0x226   : > { %v1330_v56 = vadd.f32 %v1847_v55, %v1656_v30  ;;  %v1321_v50 = vpop.f32.mrb[15].mxu1  ;;  %1861 = vmatmul.mubr.msk.bf16.gmra.mrb[24].mxu1 %vm1376_vm6, %v1354_v48  ;;  %v1347_v58 = vmax.f32 %v1327_v53, 0.0 }
 0x227   : > { %v1322_v57 = vadd.f32 %v1656_v30, %v1321_v50  ;;  %v1345_v59 = vmax.f32 %v1319_v63, 0.0 }
 0x228   : > { %v1348_v37 = vmax.f32 %v1330_v56, 0.0 }
 0x229   : > { %v1346_v0 = vmax.f32 %v1322_v57, 0.0 }
 0x22a   : > { %v1356_v60 = vpack.c.bf16 %v1348_v37, %v1347_v58 }
 0x22b   : > { %v1355_v29 = vpack.c.bf16 %v1346_v0, %v1345_v59 }
 0x22d   : > { %1864 = vmatprep.mubr.msk.bf16.mxu1 %vm1376_vm6, %v1355_v29 }
 0x22e   : > { %1865 = vmatmul.mubr.msk.bf16.gmra.mrb[28].mxu1 %vm1376_vm6, %v1356_v60 }
 0x2e9   : > { %v1854_v38 = vpop.f32.mrb[16].mxu1 }
 0x2ea   : > { %v1447_v62 = vadd.f32 %v1854_v38, %v1672_v61  ;;  %v1438_v51 = vpop.f32.mrb[17].mxu1 }
 0x2eb   : > { %v1439_v1 = vadd.f32 %v1672_v61, %v1438_v51  ;;  %v1855_v2 = vpop.f32.mrb[18].mxu1 }
 0x2ec   : > { %1504 = vst.msk [vmem:[%s2308_s26 + $0x10] sm:$0xff] %vm1501_vm7, %v1447_v62  ;;  %v1450_v6 = vadd.f32 %v1855_v2, %v1672_v61  ;;  %v1441_v30 = vpop.f32.mrb[19].mxu1 }
 0x2ed   : > { %1502 = vst.msk [vmem:[%s2308_s26] sm:$0xff] %vm1501_vm7, %v1439_v1  ;;  %v1442_v39 = vadd.f32 %v1672_v61, %v1441_v30 }
 0x2ee   : > { %1505 = vst.msk [vmem:[%s2308_s26 + $0x18] sm:$0xff] %vm1501_vm7, %v1450_v6 }
 0x2ef   : > { %1503 = vst.msk [vmem:[%s2308_s26 + $0x8] sm:$0xff] %vm1501_vm7, %v1442_v39 }
 0x2f1   : > { %v1858_v7 = vpop.f32.mrb[20].mxu1 }
 0x2f2   : > { %v1463_v8 = vadd.f32 %v1858_v7, %v1672_v61  ;;  %v1454_v9 = vpop.f32.mrb[21].mxu1 }
 0x2f3   : > { %v1455_v10 = vadd.f32 %v1672_v61, %v1454_v9  ;;  %v1859_v14 = vpop.f32.mrb[22].mxu1 }
 0x2f4   : > { %1508 = vst.msk [vmem:[%s2308_s26 + $0x30] sm:$0xff] %vm1501_vm7, %v1463_v8  ;;  %v1466_v11 = vadd.f32 %v1859_v14, %v1672_v61  ;;  %v1457_v4 = vpop.f32.mrb[23].mxu1 }
 0x2f5   : > { %1506 = vst.msk [vmem:[%s2308_s26 + $0x20] sm:$0xff] %vm1501_vm7, %v1455_v10  ;;  %v1458_v12 = vadd.f32 %v1672_v61, %v1457_v4 }
 0x2f6   : > { %1509 = vst.msk [vmem:[%s2308_s26 + $0x38] sm:$0xff] %vm1501_vm7, %v1466_v11 }
 0x2f7   : > { %1507 = vst.msk [vmem:[%s2308_s26 + $0x28] sm:$0xff] %vm1501_vm7, %v1458_v12 }
 0x2f9   : > { %v1862_v13 = vpop.f32.mrb[24].mxu1 }
 0x2fa   : > { %v1479_v15 = vadd.f32 %v1862_v13, %v1672_v61  ;;  %v1470_v16 = vpop.f32.mrb[25].mxu1 }
 0x2fb   : > { %v1471_v5 = vadd.f32 %v1672_v61, %v1470_v16  ;;  %v1863_v19 = vpop.f32.mrb[26].mxu1 }
 0x2fc   : > { %1512 = vst.msk [vmem:[%s2308_s26 + $0x50] sm:$0xff] %vm1501_vm7, %v1479_v15  ;;  %v1482_v3 = vadd.f32 %v1863_v19, %v1672_v61  ;;  %v1473_v20 = vpop.f32.mrb[27].mxu1 }
 0x2fd   : > { %1510 = vst.msk [vmem:[%s2308_s26 + $0x40] sm:$0xff] %vm1501_vm7, %v1471_v5  ;;  %v1474_v21 = vadd.f32 %v1672_v61, %v1473_v20 }
 0x2fe   : > { %1513 = vst.msk [vmem:[%s2308_s26 + $0x58] sm:$0xff] %vm1501_vm7, %v1482_v3 }
 0x2ff   : > { %1511 = vst.msk [vmem:[%s2308_s26 + $0x48] sm:$0xff] %vm1501_vm7, %v1474_v21 }
 0x301   : > { %v1866_v22 = vpop.f32.mrb[28].mxu1 }
 0x302   : > { %v1495_v23 = vadd.f32 %v1866_v22, %v1672_v61  ;;  %v1486_v24 = vpop.f32.mrb[29].mxu1 }
 0x303   : > { %v1487_v25 = vadd.f32 %v1672_v61, %v1486_v24  ;;  %v1867_v26 = vpop.f32.mrb[30].mxu1 }
 0x304   : > { %1516 = vst.msk [vmem:[%s2308_s26 + $0x70] sm:$0xff] %vm1501_vm7, %v1495_v23  ;;  %v1498_v31 = vadd.f32 %v1867_v26, %v1672_v61  ;;  %v1489_v32 = vpop.f32.mrb[31].mxu1 }
 0x305   : > { %1514 = vst.msk [vmem:[%s2308_s26 + $0x60] sm:$0xff] %vm1501_vm7, %v1487_v25  ;;  %v1490_v33 = vadd.f32 %v1672_v61, %v1489_v32 }
 0x306   : > { %1517 = vst.msk [vmem:[%s2308_s26 + $0x78] sm:$0xff] %vm1501_vm7, %v1498_v31 }
 0x307   : > { %1515 = vst.msk [vmem:[%s2308_s26 + $0x68] sm:$0xff] %vm1501_vm7, %v1490_v33 }
 0x308 PF: > { %s23_s19 = sadd.s32 1, %s1940_s19  }
 0x309   : > { %p20_p4 = scmp.ge.s32.totalorder %s23_s19, 6  }
 0x30b   :  { %22 = sbr.rel (!%p20_p4) target bundleno = 3 (0x3), region = 100 }

</bundles_post_ra>
